<compile_context>
chip_gen: v6e
topology: v6e:2x2x1
jax: 0.10.0
libtpu: 0.0.40
codegen_flags: <defaults>
</compile_context>

<pallas_src>
import jax
import jax.numpy as jnp
from jax import lax
from jax.experimental import pallas as pl
from jax.experimental.pallas import tpu as pltpu


# ----------------------------------------------------------------------------
# Plain-JAX matching glue (ssd `point_form`, `jaccard`, `encode`, `match`).
# ----------------------------------------------------------------------------
def _point_form(priors):
    # center form (cx, cy, w, h) -> corner form (xmin, ymin, xmax, ymax)
    return jnp.concatenate(
        [priors[:, :2] - priors[:, 2:] / 2.0, priors[:, :2] + priors[:, 2:] / 2.0],
        axis=1,
    )


def _jaccard(box_a, box_b):
    # box_a: (G, 4) corner form, box_b: (P, 4) corner form -> (G, P) IoU
    max_xy = jnp.minimum(box_a[:, None, 2:], box_b[None, :, 2:])
    min_xy = jnp.maximum(box_a[:, None, :2], box_b[None, :, :2])
    inter_wh = jnp.clip(max_xy - min_xy, 0.0, None)
    inter = inter_wh[..., 0] * inter_wh[..., 1]
    area_a = ((box_a[:, 2] - box_a[:, 0]) * (box_a[:, 3] - box_a[:, 1]))[:, None]
    area_b = ((box_b[:, 2] - box_b[:, 0]) * (box_b[:, 3] - box_b[:, 1]))[None, :]
    return inter / (area_a + area_b - inter)


def _encode(matched, priors, variances):
    # matched: (P, 4) corner form, priors: (P, 4) center form
    g_cxcy = (matched[:, :2] + matched[:, 2:]) / 2.0 - priors[:, :2]
    g_cxcy = g_cxcy / (variances[0] * priors[:, 2:])
    g_wh = (matched[:, 2:] - matched[:, :2]) / priors[:, 2:]
    g_wh = jnp.log(g_wh) / variances[1]
    return jnp.concatenate([g_cxcy, g_wh], axis=1)


def _match(threshold, truths, priors, variances, labels):
    """Single-image SSD matching.  truths (G,4) corner form, labels (G,)."""
    overlaps = _jaccard(truths, _point_form(priors))            # (G, P)
    best_prior_idx = jnp.argmax(overlaps, axis=1)               # (G,)
    best_truth_overlap = jnp.max(overlaps, axis=0)              # (P,)
    best_truth_idx = jnp.argmax(overlaps, axis=0)               # (P,)
    # ensure every gt box keeps its best prior
    best_truth_overlap = best_truth_overlap.at[best_prior_idx].set(2.0)
    best_truth_idx = best_truth_idx.at[best_prior_idx].set(
        jnp.arange(truths.shape[0]).astype(best_truth_idx.dtype)
    )
    matches = truths[best_truth_idx]                            # (P, 4)
    conf = labels[best_truth_idx].astype(jnp.int32) + 1         # (P,)
    conf = jnp.where(best_truth_overlap < threshold, 0, conf)
    loc = _encode(matches, priors, variances)                   # (P, 4)
    return loc.astype(jnp.float32), conf.astype(jnp.int32)


# ----------------------------------------------------------------------------
# Tile planner: pad P to a multiple of 512, pick the largest 512-multiple TP
# dividing padded P (capped by C so per-block temporaries stay small on v7x),
# and fold up to 8 images per block while keeping >= 2 parallel batch blocks.
# ----------------------------------------------------------------------------
def _plan_tiles(B, P, C):
    cap_elems = 1_000_000                      # Bb * TP * C cap (v7x-safe)
    p_pad = ((P + 511) // 512) * 512
    tp = 512
    t = 512
    while t <= min(4096, p_pad):
        if p_pad % t == 0 and t * C <= cap_elems:
            tp = t
        t += 512
    bb = 1
    for cand in (8, 4, 2):
        if B % cand == 0 and B // cand >= 2 and cand * tp * C <= cap_elems:
            bb = cand
            break
    return p_pad, tp, bb


# ----------------------------------------------------------------------------
# Fused Pallas loss kernel + wrapper
# ----------------------------------------------------------------------------
def multibox_loss(cfg, priors, loc_data, conf_data, targets, *, conf_class_major=False):
    num_classes = int(cfg["dataset"]["classno"])
    negpos_ratio = float(cfg["base"]["negpos_ratio"])
    threshold = float(cfg["base"]["conf_threshold"])
    variance = cfg["base"]["variance"]
    assert cfg["base"]["loss"] == "SmoothL1"  # TODO(synk): IoU-loss branch unimplemented

    B, P, _ = loc_data.shape
    C = num_classes
    P_pad, TP, Bb = _plan_tiles(B, P, C)
    n_p_blocks = P_pad // TP
    pad_p = P_pad - P

    # ---- matching (JAX glue) -------------------------------------------------
    truth_boxes = targets[:, :, :-1].astype(jnp.float32)    # (B, G, 4)
    truth_labels = targets[:, :, -1]                         # (B, G)
    loc_t, conf_t = jax.vmap(
        lambda t, l: _match(threshold, t, priors.astype(jnp.float32), variance, l)
    )(truth_boxes, truth_labels)
    loc_t = loc_t.astype(jnp.float32)                        # (B, P, 4)
    conf_t = conf_t.astype(jnp.int32)                        # (B, P)

    # ---- lane-dense, padded inputs for the kernel ----------------------------
    if conf_class_major:
        conf_cp = conf_data                                   # (B, C, P), input dtype
    else:
        # TODO(synk): have the detection head emit (B, C, P) directly; this
        # transpose is an extra HBM read+write pass over the largest tensor.
        conf_cp = jnp.transpose(conf_data, (0, 2, 1))
    conf_in = jnp.pad(conf_cp, ((0, 0), (0, 0), (0, pad_p)))           # (B, C, P_pad)

    loc_cat = jnp.concatenate(
        [jnp.transpose(loc_data.astype(jnp.float32), (0, 2, 1)),       # preds
         jnp.transpose(loc_t, (0, 2, 1))],                             # targets
        axis=1,
    )                                                                   # (B, 8, P)
    loc_cat = jnp.pad(loc_cat, ((0, 0), (0, 0), (0, pad_p)))            # (B, 8, P_pad)

    conf_t_pad = jnp.pad(conf_t, ((0, 0), (0, pad_p)))                  # (B, P_pad), pad=0
    conf_t_in = conf_t_pad[:, None, :]                                  # (B, 1, P_pad)

    # ---- fused per-prior loss kernel (single LSE, SmoothL1) -------------------
    def kernel(conf_ref, loc_ref, tgt_ref, ce_ref, ll_ref):
        p = pl.program_id(1)

        c = conf_ref[...].astype(jnp.float32)                 # (Bb, C, TP)
        tgt = tgt_ref[...]                                    # (Bb, 1, TP) int32
        posf = (tgt > 0).astype(jnp.float32)                  # (Bb, 1, TP)

        # per-prior log-sum-exp over classes (computed ONCE; shared by mining
        # and the final cross entropy; mathematically equal to PyTorch's form)
        rmax = jnp.max(c, axis=1, keepdims=True)              # (Bb, 1, TP)
        lse = jnp.log(jnp.sum(jnp.exp(c - rmax), axis=1, keepdims=True)) + rmax

        # gather conf[target_class] per prior via one-hot over the class axis
        cls_iota = lax.broadcasted_iota(jnp.int32, c.shape, 1)
        gathered = jnp.sum(jnp.where(cls_iota == tgt, c, 0.0), axis=1, keepdims=True)
        ce_ref[...] = lse - gathered                          # per-prior CE (Bb,1,TP)

        # localization: SmoothL1 over the 4 coords, pos-masked, reduced inside
        # the kernel to a lane-dense (Bb, 1, 128) partial that accumulates in
        # the resident output across the P grid axis.
        lp = loc_ref[...]                                     # (Bb, 8, TP) f32
        d = lp[:, 0:4, :] - lp[:, 4:8, :]
        ad = jnp.abs(d)
        sl1 = jnp.where(ad < 1.0, 0.5 * d * d, ad - 0.5) * posf
        sl1 = jnp.sum(sl1, axis=1, keepdims=True)             # (Bb, 1, TP)
        part = sl1[:, :, 0:128]
        for k in range(1, TP // 128):                         # static, lane-aligned
            part = part + sl1[:, :, k * 128:(k + 1) * 128]

        @pl.when(p == 0)
        def _():
            ll_ref[...] = jnp.zeros_like(ll_ref)
        ll_ref[...] += part

    ce_map, ll_partial = pl.pallas_call(
        kernel,
        out_shape=(
            jax.ShapeDtypeStruct((B, 1, P_pad), jnp.float32),  # per-prior CE
            jax.ShapeDtypeStruct((B, 1, 128), jnp.float32),    # SmoothL1 partials
        ),
        grid=(B // Bb, n_p_blocks),
        in_specs=[
            pl.BlockSpec((Bb, C, TP), lambda b, p: (b, 0, p)),
            pl.BlockSpec((Bb, 8, TP), lambda b, p: (b, 0, p)),
            pl.BlockSpec((Bb, 1, TP), lambda b, p: (b, 0, p)),
        ],
        out_specs=(
            pl.BlockSpec((Bb, 1, TP), lambda b, p: (b, 0, p)),
            pl.BlockSpec((Bb, 1, 128), lambda b, p: (b, 0, 0)),  # resident accumulator
        ),
        compiler_params=pltpu.CompilerParams(
            # batch axis parallel (feeds both v7x TCs); P axis must be arbitrary
            # because the SmoothL1 output block is resident/accumulated over it.
            dimension_semantics=("parallel", "arbitrary"),
            # kept at the v7x scoped default; v5e/v6e could raise it for even
            # larger tiles, but the planned blocks fit comfortably everywhere.
            vmem_limit_bytes=32 * 1024 * 1024,
        ),
    )(conf_in, loc_cat, conf_t_in)

    ce = ce_map.reshape(B, P_pad)                             # (B, P_pad)
    loss_l = jnp.sum(ll_partial)                              # scalar

    # ---- hard-negative mining on the (B, P_pad) CE map ------------------------
    pos = conf_t_pad > 0                                      # (B, P_pad), padded=False
    valid = (jnp.arange(P_pad) < P)[None, :]                  # real priors only

    loss_mine = jnp.where(pos, 0.0, ce)                       # loss_c[pos] = 0
    loss_mine = jnp.where(valid, loss_mine, -1.0)             # padded rank last (CE >= 0)

    loss_idx = jnp.argsort(-loss_mine, axis=1)                # descending, stable
    rows = jnp.arange(B)[:, None]
    cols = jnp.broadcast_to(jnp.arange(P_pad, dtype=jnp.int32)[None, :], (B, P_pad))
    # permutation inverse via scatter (replaces the second argsort)
    idx_rank = jnp.zeros((B, P_pad), jnp.int32).at[rows, loss_idx].set(cols)

    num_pos = jnp.sum(pos.astype(jnp.int32), axis=1, keepdims=True)       # (B, 1)
    num_neg = jnp.minimum(negpos_ratio * num_pos.astype(jnp.float32),
                          jnp.float32(P - 1))                 # clamp uses real P
    neg = (idx_rank.astype(jnp.float32) < num_neg) & valid    # (B, P_pad)

    sel = (pos | neg).astype(jnp.float32)
    loss_c = jnp.sum(ce * sel)

    # final normalization (f32; PyTorch's .double() is skipped on TPU)
    N = jnp.maximum(jnp.sum(num_pos).astype(jnp.float32), 1.0)
    return loss_l / N + loss_c / N


# ----------------------------------------------------------------------------
# Demo
# ----------------------------------------------------------------------------
if __name__ == "__main__":
    B, P, C, G = 2, 1024, 8, 4   # batch, priors, classes, gt objects per image

    cfg = {
        "dataset": {"classno": C},
        "base": {
            "negpos_ratio": 3,
            "conf_threshold": 0.5,
            "variance": [0.1, 0.2],
            "loss": "SmoothL1",
        },
    }

    key = jax.random.PRNGKey(0)
    k1, k2, k3, k4, k5, k6, k7 = jax.random.split(key, 7)

    # priors in center form (cx, cy, w, h)
    prior_centers = jax.random.uniform(k1, (P, 2), jnp.float32, 0.2, 0.8)
    prior_wh = jax.random.uniform(k2, (P, 2), jnp.float32, 0.1, 0.3)
    priors = jnp.concatenate([prior_centers, prior_wh], axis=1)          # (P, 4)

    # network predictions; conf is emitted class-major (B, C, P) so the kernel
    # consumes it directly with no wrapper transpose (perf-review path).
    loc_data = jax.random.normal(k3, (B, P, 4), jnp.float32) * 0.1       # (B, P, 4)
    conf_data_cp = jax.random.normal(k4, (B, C, P), jnp.float32)         # (B, C, P)

    # ground-truth targets: corner-form boxes + label  -> (B, G, 5)
    gt_centers = jax.random.uniform(k5, (B, G, 2), jnp.float32, 0.25, 0.75)
    gt_wh = jax.random.uniform(k6, (B, G, 2), jnp.float32, 0.1, 0.4)
    gt_boxes = jnp.concatenate([gt_centers - gt_wh / 2.0, gt_centers + gt_wh / 2.0], axis=-1)
    gt_labels = jax.random.randint(k7, (B, G), 0, C - 1).astype(jnp.float32)
    targets = jnp.concatenate([gt_boxes, gt_labels[..., None]], axis=-1)  # (B, G, 5)

    @jax.jit
    def loss_fn(pr, ld, cd, tg):
        return multibox_loss(cfg, pr, ld, cd, tg, conf_class_major=True)

    loss = loss_fn(priors, loc_data, conf_data_cp, targets)
    loss = jax.block_until_ready(loss)

    assert bool(jnp.isfinite(loss))
    print("KERNEL_OK")
</pallas_src>

<mosaic_0001>
module attributes {stable_mosaic.version = 11 : i64} {
  func.func @kernel(%arg0: i32, %arg1: i32, %arg2: memref<1x8x1024xf32, #tpu.memory_space<vmem>>, %arg3: memref<1x8x1024xf32, #tpu.memory_space<vmem>>, %arg4: memref<1x1x1024xi32, #tpu.memory_space<vmem>>, %arg5: memref<1x1x1024xf32, #tpu.memory_space<vmem>>, %arg6: memref<1x1x128xf32, #tpu.memory_space<vmem>>) attributes {dimension_semantics = [#tpu.dimension_semantics<parallel>, #tpu.dimension_semantics<arbitrary>], iteration_bounds = array<i64: 2, 1>, scalar_prefetch = 0 : i64, scratch_operands = 0 : i64, tpu.core_type = #tpu.core_type<tc>, window_params = [{transform_indices = @transform_0, window_bounds = array<i64: 1, 8, 1024>}, {transform_indices = @transform_1, window_bounds = array<i64: 1, 8, 1024>}, {transform_indices = @transform_2, window_bounds = array<i64: 1, 1, 1024>}, {transform_indices = @transform_3, window_bounds = array<i64: 1, 1, 1024>}, {transform_indices = @transform_4, window_bounds = array<i64: 1, 1, 128>}]} {
    %c0 = arith.constant 0 : index
    %c0_0 = arith.constant 0 : index
    %c0_1 = arith.constant 0 : index
    %0 = vector.load %arg2[%c0, %c0_0, %c0_1] : memref<1x8x1024xf32, #tpu.memory_space<vmem>>, vector<1x8x1024xf32>
    %c0_2 = arith.constant 0 : index
    %c0_3 = arith.constant 0 : index
    %c0_4 = arith.constant 0 : index
    %1 = vector.load %arg4[%c0_2, %c0_3, %c0_4] : memref<1x1x1024xi32, #tpu.memory_space<vmem>>, vector<1x1x1024xi32>
    %c0_i32 = arith.constant 0 : i32
    %2 = vector.broadcast %c0_i32 : i32 to vector<1x1x1024xi32>
    %3 = arith.cmpi sgt, %1, %2 : vector<1x1x1024xi32>
    %4 = arith.extui %3 : vector<1x1x1024xi1> to vector<1x1x1024xi32>
    %5 = arith.sitofp %4 : vector<1x1x1024xi32> to vector<1x1x1024xf32>
    %cst = arith.constant dense<0xFF800000> : vector<1x1024xf32>
    %6 = vector.multi_reduction <maximumf>, %0, %cst [1] : vector<1x8x1024xf32> to vector<1x1024xf32>
    %7 = vector.shape_cast %6 : vector<1x1024xf32> to vector<1x1x1024xf32>
    %8 = vector.broadcast %7 : vector<1x1x1024xf32> to vector<1x8x1024xf32>
    %9 = arith.subf %0, %8 : vector<1x8x1024xf32>
    %10 = math.exp %9 : vector<1x8x1024xf32>
    %cst_5 = arith.constant dense<0.000000e+00> : vector<1x1024xf32>
    %11 = vector.multi_reduction <add>, %10, %cst_5 [1] : vector<1x8x1024xf32> to vector<1x1024xf32>
    %12 = vector.shape_cast %11 : vector<1x1024xf32> to vector<1x1x1024xf32>
    %13 = math.log %12 : vector<1x1x1024xf32>
    %14 = arith.addf %13, %7 : vector<1x1x1024xf32>
    %15 = tpu.iota {dimensions = array<i32: 1>} : vector<1x8x1024xi32>
    %16 = vector.broadcast %1 : vector<1x1x1024xi32> to vector<1x8x1024xi32>
    %17 = arith.cmpi eq, %15, %16 : vector<1x8x1024xi32>
    %cst_6 = arith.constant 0.000000e+00 : f32
    %18 = vector.broadcast %cst_6 : f32 to vector<1x8x1024xf32>
    %19 = arith.select %17, %0, %18 : vector<1x8x1024xi1>, vector<1x8x1024xf32>
    %cst_7 = arith.constant dense<0.000000e+00> : vector<1x1024xf32>
    %20 = vector.multi_reduction <add>, %19, %cst_7 [1] : vector<1x8x1024xf32> to vector<1x1024xf32>
    %21 = vector.shape_cast %20 : vector<1x1024xf32> to vector<1x1x1024xf32>
    %22 = arith.subf %14, %21 : vector<1x1x1024xf32>
    %c0_8 = arith.constant 0 : index
    %c0_9 = arith.constant 0 : index
    %c0_10 = arith.constant 0 : index
    %23 = vector.load %arg5[%c0_8, %c0_9, %c0_10] : memref<1x1x1024xf32, #tpu.memory_space<vmem>>, vector<1x1x1024xf32>
    tpu.vector_store %arg5[%c0_8, %c0_9, %c0_10], %22 {strides = array<i32>} : memref<1x1x1024xf32, #tpu.memory_space<vmem>>, vector<1x1x1024xf32>,
    %c0_11 = arith.constant 0 : index
    %c0_12 = arith.constant 0 : index
    %c0_13 = arith.constant 0 : index
    %24 = vector.load %arg3[%c0_11, %c0_12, %c0_13] : memref<1x8x1024xf32, #tpu.memory_space<vmem>>, vector<1x8x1024xf32>
    %25 = vector.extract_strided_slice %24 {offsets = [0, 0, 0], sizes = [1, 4, 1024], strides = [1, 1, 1]} : vector<1x8x1024xf32> to vector<1x4x1024xf32>
    %26 = vector.extract_strided_slice %24 {offsets = [0, 4, 0], sizes = [1, 4, 1024], strides = [1, 1, 1]} : vector<1x8x1024xf32> to vector<1x4x1024xf32>
    %27 = arith.subf %25, %26 : vector<1x4x1024xf32>
    %28 = math.absf %27 : vector<1x4x1024xf32>
    %cst_14 = arith.constant 1.000000e+00 : f32
    %29 = vector.broadcast %cst_14 : f32 to vector<1x4x1024xf32>
    %30 = arith.cmpf olt, %28, %29 : vector<1x4x1024xf32>
    %cst_15 = arith.constant 5.000000e-01 : f32
    %31 = vector.broadcast %cst_15 : f32 to vector<1x4x1024xf32>
    %32 = arith.mulf %31, %27 : vector<1x4x1024xf32>
    %33 = arith.mulf %32, %27 : vector<1x4x1024xf32>
    %cst_16 = arith.constant 5.000000e-01 : f32
    %34 = vector.broadcast %cst_16 : f32 to vector<1x4x1024xf32>
    %35 = arith.subf %28, %34 : vector<1x4x1024xf32>
    %36 = arith.select %30, %33, %35 : vector<1x4x1024xi1>, vector<1x4x1024xf32>
    %37 = vector.broadcast %5 : vector<1x1x1024xf32> to vector<1x4x1024xf32>
    %38 = arith.mulf %36, %37 : vector<1x4x1024xf32>
    %cst_17 = arith.constant dense<0.000000e+00> : vector<1x1024xf32>
    %39 = vector.multi_reduction <add>, %38, %cst_17 [1] : vector<1x4x1024xf32> to vector<1x1024xf32>
    %40 = vector.shape_cast %39 : vector<1x1024xf32> to vector<1x1x1024xf32>
    %41 = vector.extract_strided_slice %40 {offsets = [0, 0, 0], sizes = [1, 1, 128], strides = [1, 1, 1]} : vector<1x1x1024xf32> to vector<1x1x128xf32>
    %42 = vector.extract_strided_slice %40 {offsets = [0, 0, 128], sizes = [1, 1, 128], strides = [1, 1, 1]} : vector<1x1x1024xf32> to vector<1x1x128xf32>
    %43 = arith.addf %41, %42 : vector<1x1x128xf32>
    %44 = vector.extract_strided_slice %40 {offsets = [0, 0, 256], sizes = [1, 1, 128], strides = [1, 1, 1]} : vector<1x1x1024xf32> to vector<1x1x128xf32>
    %45 = arith.addf %43, %44 : vector<1x1x128xf32>
    %46 = vector.extract_strided_slice %40 {offsets = [0, 0, 384], sizes = [1, 1, 128], strides = [1, 1, 1]} : vector<1x1x1024xf32> to vector<1x1x128xf32>
    %47 = arith.addf %45, %46 : vector<1x1x128xf32>
    %48 = vector.extract_strided_slice %40 {offsets = [0, 0, 512], sizes = [1, 1, 128], strides = [1, 1, 1]} : vector<1x1x1024xf32> to vector<1x1x128xf32>
    %49 = arith.addf %47, %48 : vector<1x1x128xf32>
    %50 = vector.extract_strided_slice %40 {offsets = [0, 0, 640], sizes = [1, 1, 128], strides = [1, 1, 1]} : vector<1x1x1024xf32> to vector<1x1x128xf32>
    %51 = arith.addf %49, %50 : vector<1x1x128xf32>
    %52 = vector.extract_strided_slice %40 {offsets = [0, 0, 768], sizes = [1, 1, 128], strides = [1, 1, 1]} : vector<1x1x1024xf32> to vector<1x1x128xf32>
    %53 = arith.addf %51, %52 : vector<1x1x128xf32>
    %54 = vector.extract_strided_slice %40 {offsets = [0, 0, 896], sizes = [1, 1, 128], strides = [1, 1, 1]} : vector<1x1x1024xf32> to vector<1x1x128xf32>
    %55 = arith.addf %53, %54 : vector<1x1x128xf32>
    %c0_i32_18 = arith.constant 0 : i32
    %56 = arith.cmpi eq, %arg1, %c0_i32_18 : i32
    %57 = arith.extui %56 : i1 to i32
    %c0_i32_19 = arith.constant 0 : i32
    %58 = arith.cmpi ne, %57, %c0_i32_19 : i32
    scf.if %58 {
      %cst_26 = arith.constant 0.000000e+00 : f32
      %62 = vector.broadcast %cst_26 : f32 to vector<1x1x128xf32>
      %c0_27 = arith.constant 0 : index
      %c0_28 = arith.constant 0 : index
      %c0_29 = arith.constant 0 : index
      %63 = vector.load %arg6[%c0_27, %c0_28, %c0_29] : memref<1x1x128xf32, #tpu.memory_space<vmem>>, vector<1x1x128xf32>
      tpu.vector_store %arg6[%c0_27, %c0_28, %c0_29], %62 {strides = array<i32>} : memref<1x1x128xf32, #tpu.memory_space<vmem>>, vector<1x1x128xf32>,
    } else {
    }
    %c0_20 = arith.constant 0 : index
    %c0_21 = arith.constant 0 : index
    %c0_22 = arith.constant 0 : index
    %59 = vector.load %arg6[%c0_20, %c0_21, %c0_22] : memref<1x1x128xf32, #tpu.memory_space<vmem>>, vector<1x1x128xf32>
    %60 = arith.addf %59, %55 : vector<1x1x128xf32>
    %c0_23 = arith.constant 0 : index
    %c0_24 = arith.constant 0 : index
    %c0_25 = arith.constant 0 : index
    %61 = vector.load %arg6[%c0_23, %c0_24, %c0_25] : memref<1x1x128xf32, #tpu.memory_space<vmem>>, vector<1x1x128xf32>
    tpu.vector_store %arg6[%c0_23, %c0_24, %c0_25], %60 {strides = array<i32>} : memref<1x1x128xf32, #tpu.memory_space<vmem>>, vector<1x1x128xf32>,
    return
  }
  func.func @transform_0(%arg0: i32, %arg1: i32) -> (i32, i32, i32) {
    %c0_i32 = arith.constant 0 : i32
    %c0_i32_0 = arith.constant 0 : i32
    return %arg0, %c0_i32, %arg1 : i32, i32, i32
  }
  func.func @transform_1(%arg0: i32, %arg1: i32) -> (i32, i32, i32) {
    %c0_i32 = arith.constant 0 : i32
    %c0_i32_0 = arith.constant 0 : i32
    return %arg0, %c0_i32, %arg1 : i32, i32, i32
  }
  func.func @transform_2(%arg0: i32, %arg1: i32) -> (i32, i32, i32) {
    %c0_i32 = arith.constant 0 : i32
    %c0_i32_0 = arith.constant 0 : i32
    return %arg0, %c0_i32, %arg1 : i32, i32, i32
  }
  func.func @transform_3(%arg0: i32, %arg1: i32) -> (i32, i32, i32) {
    %c0_i32 = arith.constant 0 : i32
    %c0_i32_0 = arith.constant 0 : i32
    return %arg0, %c0_i32, %arg1 : i32, i32, i32
  }
  func.func @transform_4(%arg0: i32, %arg1: i32) -> (i32, i32, i32) {
    %c0_i32 = arith.constant 0 : i32
    %c0_i32_0 = arith.constant 0 : i32
    %c0_i32_1 = arith.constant 0 : i32
    return %arg0, %c0_i32, %c0_i32_0 : i32, i32, i32
  }
}

</mosaic_0001>

<bundles_post_ra>
// kernel: loss_fn.1
= control target key start
LH: loop header
LB: loop body
LE: loop exit
PB: predicated region body
PF: predicated region fallthrough
CT: control target
= control target key end

     0   :  { %s1115_s15 = smov 0   ;;  %s1117_s16 = smov 0   ;;  %s1537_s0 = inlined_call_operand.vmem [shape: f32[2,8,1024], index: 0, kind: input, shape index: {}]   ;;  %s1538_s1 = inlined_call_operand.vmem [shape: f32[2,8,1024], index: 1, kind: input, shape index: {}]   ;;  %s1539_s2 = inlined_call_operand.vmem [shape: s32[2,1,1024], index: 2, kind: input, shape index: {}]   ;;  %s1540_s3 = inlined_call_operand.vmem [shape: f32[2,1,1024], index: 3, kind: output, shape index: {0}]   ;;  %s1541_s4 = inlined_call_operand.vmem [shape: f32[2,1,128], index: 4, kind: output, shape index: {1}]  }
   0x1   :  { %s1119_s17 = smov 0  }
   0x2 LB: > { %s27_s18 = sadd.s32 1, %s1082_s16  ;;  %p986_p0 = scmp.ge.s32.totalorder %s1086_s17, 1  ;;  %s1086_s17 = sphi %s1119_s17, %s15_s17   ;;  %s1082_s16 = sphi %s1117_s16, %s1559_s16   ;;  %s1078_s15 = sphi %s1115_s15, %s1558_s15  }
   0x3   : > { %p29_p1 = scmp.ge.s32.totalorder %s27_s18, 2  ;;  %p219_p2 = scmp.lt.s32.totalorder %s1086_s17, 3 }
   0x5   : > { %s1561_s18 = smov (%p29_p1, %s27_s18), 0  ;;  %p220_p3 = pnand %p986_p0, %p219_p2 }
   0x6   : > { %p273_p4 = scmp.lt.s32.totalorder (!%p220_p3), %s1078_s15, 1 }
   0x7   : > { %223 = sbr.rel (%p220_p3) target bundleno = 128 (0x80), region = 32 }
   0xc   : > { %v469_v0 = vlaneseq  ;;  %s1563_s15 = smov (!%p273_p4, %s1078_s15), 1  ;;  %v1088_v2 = vmov 1966171168   ;;  %v1089_v4 = vmov 0.0  }
   0xd   : > { %v1137_v3 = vunpack.c.l.s4 %v1088_v2  ;;  %s1143_s21 = scalar_lea.vmem %s1541_s4, %s1563_s15  ;;  %s1004_s22 = sshll.u32 %s1563_s15, 6 }
   0xe   : > { %v1135_v1 = vshrl.u32 %v469_v0, 7  ;;  %839 = vst [vmem:[%s1143_s21] sm:$0x1] %v1089_v4  ;;  %s280_s25 = scalar_lea.vmem %s1537_s0, %s1004_s22  ;;  %s991_s26 = sshll.u32 %s1563_s15, 3 }
   0xf   : > { %v1155_v7 = vld [vmem:[%s280_s25] sm:$0xff]  ;;  %v1157_v8 = vld [vmem:[%s280_s25 + $0x8] sm:$0xff]  ;;  %v1159_v9 = vld [vmem:[%s280_s25 + $0x10] sm:$0xff]  ;;  %v589_v19 = vunpack.c.0.s8 %v1137_v3  ;;  %s299_s29 = scalar_lea.vmem %s1539_s2, %s991_s26  ;;  %s290_s6 = scalar_lea.vmem %s1538_s1, %s1004_s22 }
  0x10   : > { %v473_v5 = vsub.s32 0, %v1135_v1  ;;  %v477_v6 = vsub.s32 1, %v1135_v1  ;;  %v481_v10 = vsub.s32 2, %v1135_v1  ;;  %v485_v11 = vsub.s32 3, %v1135_v1  ;;  %v1164_v13 = vld [vmem:[%s280_s25 + $0x18] sm:$0xff]  ;;  %v1166_v14 = vld [vmem:[%s280_s25 + $0x20] sm:$0xff]  ;;  %s308_s9 = scalar_lea.vmem %s1540_s3, %s991_s26 }
  0x11   : > { %v489_v12 = vsub.s32 4, %v1135_v1  ;;  %v1168_v15 = vld [vmem:[%s280_s25 + $0x28] sm:$0xff]  ;;  %v325_v16 = vrot.slane %v1155_v7, 4  ;;  %v331_v17 = vrot.slane %v1157_v8, 4  ;;  %v337_v18 = vrot.slane %v1159_v9, 4  ;;  %v1174_v20 = vld [vmem:[%s280_s25 + $0x30] sm:$0xff] }
  0x12   : > { %v343_v21 = vrot.slane %v1164_v13, 4  ;;  %v349_v22 = vrot.slane %v1166_v14, 4  ;;  %v355_v23 = vrot.slane %v1168_v15, 4  ;;  %v493_v24 = vsub.s32 5, %v1135_v1  ;;  %v1180_v25 = vld [vmem:[%s280_s25 + $0x38] sm:$0xff] }
  0x13   : > { %v326_v26 = vmax.f32 %v1155_v7, %v325_v16  ;;  %v332_v27 = vmax.f32 %v1157_v8, %v331_v17  ;;  %v338_v28 = vmax.f32 %v1159_v9, %v337_v18  ;;  %v497_v29 = vsub.s32 6, %v1135_v1 }
  0x14   : > { %v344_v30 = vmax.f32 %v1164_v13, %v343_v21  ;;  %v350_v31 = vmax.f32 %v1166_v14, %v349_v22  ;;  %v356_v32 = vmax.f32 %v1168_v15, %v355_v23  ;;  %v501_v33 = vsub.s32 7, %v1135_v1  ;;  %v1218_v22 = vld [vmem:[%s299_s29] sm:$0xff] }
  0x15   : > { %v327_v34 = vrot.slane %v326_v26, 2  ;;  %v333_v35 = vrot.slane %v332_v27, 2  ;;  %v339_v36 = vrot.slane %v338_v28, 2  ;;  %v361_v37 = vrot.slane %v1174_v20, 4 }
  0x16   : > { %v345_v38 = vrot.slane %v344_v30, 2  ;;  %v351_v39 = vrot.slane %v350_v31, 2  ;;  %v357_v40 = vrot.slane %v356_v32, 2  ;;  %v367_v41 = vrot.slane %v1180_v25, 4 }
  0x17   : > { %v328_v42 = vmax.f32 %v326_v26, %v327_v34  ;;  %v334_v43 = vmax.f32 %v332_v27, %v333_v35  ;;  %v340_v44 = vmax.f32 %v338_v28, %v339_v36  ;;  %v362_v45 = vmax.f32 %v1174_v20, %v361_v37 }
  0x18   : > { %v346_v46 = vmax.f32 %v344_v30, %v345_v38  ;;  %v352_v47 = vmax.f32 %v350_v31, %v351_v39  ;;  %v358_v48 = vmax.f32 %v356_v32, %v357_v40  ;;  %v368_v49 = vmax.f32 %v1180_v25, %v367_v41 }
  0x19   : > { %v329_v50 = vrot.slane %v328_v42, 1  ;;  %v335_v51 = vrot.slane %v334_v43, 1  ;;  %v341_v52 = vrot.slane %v340_v44, 1  ;;  %v363_v53 = vrot.slane %v362_v45, 2 }
  0x1a   : > { %v347_v54 = vrot.slane %v346_v46, 1  ;;  %v353_v55 = vrot.slane %v352_v47, 1  ;;  %v359_v56 = vrot.slane %v358_v48, 1  ;;  %v369_v57 = vrot.slane %v368_v49, 2 }
  0x1b   : > { %v1200_v58 = vmax.f32 %v328_v42, %v329_v50  ;;  %v1202_v59 = vmax.f32 %v334_v43, %v335_v51  ;;  %v1204_v60 = vmax.f32 %v340_v44, %v341_v52  ;;  %v364_v61 = vmax.f32 %v362_v45, %v363_v53 }
  0x1c   : > { %v1206_v62 = vmax.f32 %v346_v46, %v347_v54  ;;  %v1208_v63 = vmax.f32 %v352_v47, %v353_v55  ;;  %v1210_v0 = vmax.f32 %v358_v48, %v359_v56  ;;  %v370_v2 = vmax.f32 %v368_v49, %v369_v57 }
  0x1d   : > { %v365_v16 = vrot.slane %v364_v61, 1  ;;  %v373_v17 = vsub.f32 %v1155_v7, %v1200_v58  ;;  %v374_v18 = vsub.f32 %v1157_v8, %v1202_v59  ;;  %v375_v21 = vsub.f32 %v1159_v9, %v1204_v60 }
  0x1e   : > { %v371_v23 = vrot.slane %v370_v2, 1  ;;  %v376_v26 = vsub.f32 %v1164_v13, %v1206_v62  ;;  %v377_v27 = vsub.f32 %v1166_v14, %v1208_v63  ;;  %v378_v28 = vsub.f32 %v1168_v15, %v1210_v0 }
  0x1f   : > { %v1226_v30 = vmax.f32 %v364_v61, %v365_v16  ;;  %v381_v31 = vmul.f32 1.442695, %v373_v17  ;;  %v383_v32 = vmul.f32 1.442695, %v374_v18  ;;  %v385_v34 = vmul.f32 1.442695, %v375_v21 }
  0x20   : > { %v1228_v35 = vmax.f32 %v370_v2, %v371_v23  ;;  %v387_v36 = vmul.f32 1.442695, %v376_v26  ;;  %v389_v37 = vmul.f32 1.442695, %v377_v27  ;;  %v391_v38 = vmul.f32 1.442695, %v378_v28 }
  0x21   : > { %v379_v39 = vsub.f32 %v1174_v20, %v1226_v30  ;;  %1032 = vpow2.f32 %v381_v31  ;;  %v474_v40 = vrot.slane %v1218_v22, %v473_v5  ;;  %v478_v41 = vrot.slane %v1218_v22, %v477_v6 }
  0x22   : > { %v380_v42 = vsub.f32 %v1180_v25, %v1228_v35  ;;  %1034 = vpow2.f32 %v383_v32  ;;  %v482_v43 = vrot.slane %v1218_v22, %v481_v10  ;;  %v486_v44 = vrot.slane %v1218_v22, %v485_v11 }
  0x23   : > { %1036 = vpow2.f32 %v385_v34  ;;  %v393_v45 = vmul.f32 1.442695, %v379_v39  ;;  %v490_v46 = vrot.slane %v1218_v22, %v489_v12  ;;  %v494_v47 = vrot.slane %v1218_v22, %v493_v24 }
  0x24   : > { %vm322_vm0 = vcmp.gt.s32.totalorder %v1218_v22, 0  ;;  %1038 = vpow2.f32 %v387_v36  ;;  %v395_v48 = vmul.f32 1.442695, %v380_v42  ;;  %v498_v49 = vrot.slane %v1218_v22, %v497_v29 }
  0x25   : > { %v502_v50 = vrot.slane %v1218_v22, %v501_v33  ;;  %1040 = vpow2.f32 %v389_v37  ;;  %vm503_vm1 = vcmp.eq.s32.totalorder %v1135_v1, %v474_v40  ;;  %vm504_vm2 = vcmp.eq.s32.totalorder %v1135_v1, %v478_v41 }
  0x26   : > { %vm505_vm3 = vcmp.eq.s32.totalorder %v1135_v1, %v482_v43  ;;  %1042 = vpow2.f32 %v391_v38  ;;  %vm506_vm4 = vcmp.eq.s32.totalorder %v1135_v1, %v486_v44  ;;  %vm507_vm5 = vcmp.eq.s32.totalorder %v1135_v1, %v490_v46 }
  0x27   : > { %vm508_vm6 = vcmp.eq.s32.totalorder %v1135_v1, %v494_v47  ;;  %1044 = vpow2.f32 %v393_v45  ;;  %vm509_vm7 = vcmp.eq.s32.totalorder %v1135_v1, %v498_v49  ;;  %vm510_vm8 = vcmp.eq.s32.totalorder %v1135_v1, %v502_v50 }
  0x28   : > { %v511_v51 = vsel %vm503_vm1, %v1155_v7, 0.0  ;;  %1046 = vpow2.f32 %v395_v48  ;;  %v512_v52 = vsel %vm504_vm2, %v1157_v8, 0.0  ;;  %v513_v53 = vsel %vm505_vm3, %v1159_v9, 0.0 }
  0x29   : > { %v514_v54 = vsel %vm506_vm4, %v1164_v13, 0.0  ;;  %v515_v55 = vsel %vm507_vm5, %v1166_v14, 0.0  ;;  %v516_v56 = vsel %vm508_vm6, %v1168_v15, 0.0  ;;  %v517_v57 = vsel %vm509_vm7, %v1174_v20, 0.0 }
  0x2a   : > { %v518_v61 = vsel %vm510_vm8, %v1180_v25, 0.0  ;;  %v519_v2 = vrot.slane %v511_v51, 4  ;;  %v525_v16 = vrot.slane %v512_v52, 4  ;;  %v531_v17 = vrot.slane %v513_v53, 4 }
  0x2b   : > { %v537_v18 = vrot.slane %v514_v54, 4  ;;  %v543_v7 = vrot.slane %v515_v55, 4  ;;  %v549_v21 = vrot.slane %v516_v56, 4  ;;  %v555_v23 = vrot.slane %v517_v57, 4 }
  0x2c   : > { %v561_v8 = vrot.slane %v518_v61, 4  ;;  %v520_v26 = vadd.f32 %v519_v2, %v511_v51  ;;  %v526_v9 = vadd.f32 %v525_v16, %v512_v52  ;;  %v532_v27 = vadd.f32 %v531_v17, %v513_v53 }
  0x2d   : > { %v538_v13 = vadd.f32 %v537_v18, %v514_v54  ;;  %v544_v28 = vadd.f32 %v543_v7, %v515_v55  ;;  %v1275_v14 = vadd.f32 %v549_v21, %v516_v56  ;;  %v1277_v15 = vadd.f32 %v555_v23, %v517_v57 }
  0x2e   : > { %v1033_v20 = vpop.eup %1032  ;;  %v521_v31 = vrot.slane %v520_v26, 2  ;;  %v527_v25 = vrot.slane %v526_v9, 2  ;;  %v533_v32 = vrot.slane %v532_v27, 2  ;;  %v1282_v37 = vsel %vm322_vm0, 1.0, %v1089_v4 }
  0x2f   : > { %v539_v34 = vrot.slane %v538_v13, 2  ;;  %v1035_v36 = vpop.eup %1034  ;;  %v397_v38 = vrot.slane %v1033_v20, 4  ;;  %v545_v39 = vrot.slane %v544_v28, 2  ;;  %v1287_v40 = vsub.s32 %v589_v19, %v1135_v1 }
  0x30   : > { %v1037_v41 = vpop.eup %1036  ;;  %v403_v42 = vrot.slane %v1035_v36, 4  ;;  %v1289_v43 = vadd.f32 %v521_v31, %v520_v26  ;;  %v551_v44 = vrot.slane %v1275_v14, 2  ;;  %v1292_v45 = vadd.f32 %v561_v8, %v518_v61 }
  0x31   : > { %v1039_v46 = vpop.eup %1038  ;;  %v398_v47 = vadd.f32 %v1033_v20, %v397_v38  ;;  %v409_v22 = vrot.slane %v1037_v41, 4  ;;  %v1294_v4 = vadd.f32 %v527_v25, %v526_v9  ;;  %v557_v48 = vrot.slane %v1277_v15, 2 }
  0x32   : > { %v1041_v49 = vpop.eup %1040  ;;  %v404_v50 = vadd.f32 %v1035_v36, %v403_v42  ;;  %v415_v3 = vrot.slane %v1039_v46, 4  ;;  %v1297_v19 = vadd.f32 %v533_v32, %v532_v27  ;;  %v1299_v51 = vadd.f32 %v539_v34, %v538_v13 }
  0x33   : > { %v1043_v52 = vpop.eup %1042  ;;  %v399_v53 = vrot.slane %v398_v47, 2  ;;  %v410_v54 = vadd.f32 %v1037_v41, %v409_v22  ;;  %v421_v55 = vrot.slane %v1041_v49, 4  ;;  %v1301_v56 = vadd.f32 %v545_v39, %v544_v28 }
  0x34   : > { %v1045_v57 = vpop.eup %1044  ;;  %v405_v61 = vrot.slane %v404_v50, 2  ;;  %v416_v2 = vadd.f32 %v1039_v46, %v415_v3  ;;  %v427_v16 = vrot.slane %v1043_v52, 4  ;;  %v523_v17 = vrot.slane %v1289_v43, 1 }
  0x35   : > { %v1047_v18 = vpop.eup %1046  ;;  %v400_v7 = vadd.f32 %v399_v53, %v398_v47  ;;  %v411_v21 = vrot.slane %v410_v54, 2  ;;  %v422_v23 = vadd.f32 %v1041_v49, %v421_v55  ;;  %v433_v8 = vrot.slane %v1045_v57, 4 }
  0x36   : > { %v406_v26 = vadd.f32 %v405_v61, %v404_v50  ;;  %v417_v9 = vrot.slane %v416_v2, 2  ;;  %v428_v27 = vadd.f32 %v1043_v52, %v427_v16  ;;  %v439_v13 = vrot.slane %v1047_v18, 4 }
  0x37   : > { %v401_v20 = vrot.slane %v400_v7, 1  ;;  %v412_v31 = vadd.f32 %v411_v21, %v410_v54  ;;  %v423_v25 = vrot.slane %v422_v23, 2  ;;  %v434_v28 = vadd.f32 %v1045_v57, %v433_v8 }
  0x38   : > { %v407_v32 = vrot.slane %v406_v26, 1  ;;  %v418_v34 = vadd.f32 %v417_v9, %v416_v2  ;;  %v429_v36 = vrot.slane %v428_v27, 2  ;;  %v440_v38 = vadd.f32 %v1047_v18, %v439_v13 }
  0x39   : > { %v402_v39 = vadd.f32 %v401_v20, %v400_v7  ;;  %v413_v41 = vrot.slane %v412_v31, 1  ;;  %v424_v42 = vadd.f32 %v423_v25, %v422_v23  ;;  %v435_v46 = vrot.slane %v434_v28, 2 }
  0x3a   : > { %v408_v47 = vadd.f32 %v407_v32, %v406_v26  ;;  %v419_v22 = vrot.slane %v418_v34, 1  ;;  %v430_v49 = vadd.f32 %v429_v36, %v428_v27  ;;  %v441_v3 = vrot.slane %v440_v38, 2 }
  0x3b   : > { %v414_v50 = vadd.f32 %v413_v41, %v412_v31  ;;  %v425_v52 = vrot.slane %v424_v42, 1  ;;  %v436_v53 = vadd.f32 %v435_v46, %v434_v28  ;;  %1048 = vlog2.f32 %v402_v39  ;;  %v639_v39 = vld [vmem:[%s290_s6 + $0x28] sm:$0xff]  ;;  %v640_v41 = vld [vmem:[%s290_s6 + $0x30] sm:$0xff] }
  0x3c   : > { %v420_v54 = vadd.f32 %v419_v22, %v418_v34  ;;  %v431_v55 = vrot.slane %v430_v49, 1  ;;  %v442_v57 = vadd.f32 %v441_v3, %v440_v38  ;;  %1050 = vlog2.f32 %v408_v47 }
  0x3d   : > { %v426_v61 = vadd.f32 %v425_v52, %v424_v42  ;;  %v437_v2 = vrot.slane %v436_v53, 1  ;;  %1052 = vlog2.f32 %v414_v50  ;;  %v529_v16 = vrot.slane %v1294_v4, 1  ;;  %v641_v42 = vld [vmem:[%s290_s6 + $0x38] sm:$0xff] }
  0x3e   : > { %v432_v18 = vadd.f32 %v431_v55, %v430_v49  ;;  %v443_v7 = vrot.slane %v442_v57, 1  ;;  %1054 = vlog2.f32 %v420_v54  ;;  %v535_v21 = vrot.slane %v1297_v19, 1 }
  0x3f   : > { %v438_v23 = vadd.f32 %v437_v2, %v436_v53  ;;  %1056 = vlog2.f32 %v426_v61  ;;  %v541_v8 = vrot.slane %v1299_v51, 1  ;;  %v547_v26 = vrot.slane %v1301_v56, 1 }
  0x40   : > { %v444_v9 = vadd.f32 %v443_v7, %v442_v57  ;;  %1058 = vlog2.f32 %v432_v18  ;;  %v552_v27 = vadd.f32 %v551_v44, %v1275_v14  ;;  %v558_v13 = vadd.f32 %v557_v48, %v1277_v15  ;;  %v634_v14 = vld [vmem:[%s290_s6] sm:$0xff]  ;;  %v635_v44 = vld [vmem:[%s290_s6 + $0x8] sm:$0xff]  ;;  %v637_v48 = vld [vmem:[%s290_s6 + $0x18] sm:$0xff] }
  0x41   : > { %1060 = vlog2.f32 %v438_v23  ;;  %v1320_v20 = vadd.f32 %v523_v17, %v1289_v43  ;;  %v1323_v31 = vadd.f32 %v529_v16, %v1294_v4  ;;  %v563_v25 = vrot.slane %v1292_v45, 2  ;;  %v636_v4 = vld [vmem:[%s290_s6 + $0x10] sm:$0xff]  ;;  %v638_v17 = vld [vmem:[%s290_s6 + $0x20] sm:$0xff] }
  0x42   : > { %1062 = vlog2.f32 %v444_v9  ;;  %v1327_v28 = vadd.f32 %v535_v21, %v1297_v19  ;;  %v553_v32 = vrot.slane %v552_v27, 1  ;;  %v559_v34 = vrot.slane %v558_v13, 1 }
  0x43   : > { %v1330_v36 = vadd.f32 %v541_v8, %v1299_v51  ;;  %v1333_v15 = vadd.f32 %v547_v26, %v1301_v56  ;;  %v564_v43 = vadd.f32 %v563_v25, %v1292_v45  ;;  %v1339_v19 = vrot.slane %v1282_v37, %v473_v5 }
  0x44   : > { %v1341_v38 = vadd.f32 %v553_v32, %v552_v27  ;;  %v1346_v51 = vrot.slane %v1282_v37, %v477_v6  ;;  %v1351_v45 = vrot.slane %v1282_v37, %v481_v10  ;;  %v1356_v5 = vrot.slane %v1282_v37, %v485_v11 }
  0x45   : > { %v1358_v56 = vadd.f32 %v559_v34, %v558_v13  ;;  %v565_v46 = vrot.slane %v564_v43, 1  ;;  %v1363_v47 = vrot.slane %v1282_v37, %v489_v12  ;;  %v650_v6 = vrot.slane %v634_v14, 4 }
  0x46   : > { %v651_v22 = vrot.slane %v635_v44, 4  ;;  %v652_v49 = vrot.slane %v636_v4, 4  ;;  %v653_v3 = vrot.slane %v637_v48, 4  ;;  %v654_v50 = vrot.slane %v638_v17, 4 }
  0x47   : > { %v1368_v10 = vrot.slane %v1282_v37, %v493_v24  ;;  %v655_v11 = vrot.slane %v639_v39, 4  ;;  %v656_v52 = vrot.slane %v640_v41, 4  ;;  %v657_v53 = vrot.slane %v641_v42, 4 }
  0x48   : > { %v1049_v54 = vpop.eup %1048  ;;  %v1370_v55 = vsub.f32 %v634_v14, %v650_v6  ;;  %v1372_v57 = vsub.f32 %v635_v44, %v651_v22  ;;  %v1374_v12 = vsub.f32 %v636_v4, %v652_v49  ;;  %v1376_v61 = vsub.f32 %v637_v48, %v653_v3 }
  0x49   : > { %v1051_v2 = vpop.eup %1050  ;;  %v446_v16 = vmul.f32 0.6931472, %v1049_v54  ;;  %v566_v18 = vadd.f32 %v565_v46, %v564_v43  ;;  %v1381_v24 = vrot.slane %v1282_v37, %v497_v29  ;;  %v1383_v7 = vsub.f32 %v638_v17, %v654_v50 }
  0x4a   : > { %v1053_v21 = vpop.eup %1052  ;;  %v448_v23 = vmul.f32 0.6931472, %v1051_v2  ;;  %v1385_v8 = vsub.f32 %v639_v39, %v655_v11  ;;  %v1387_v26 = vsub.f32 %v640_v41, %v656_v52  ;;  %v1389_v9 = vsub.f32 %v641_v42, %v657_v53 }
  0x4b   : > { %v1055_v27 = vpop.eup %1054  ;;  %v450_v13 = vmul.f32 0.6931472, %v1053_v21  ;;  %v461_v25 = vadd.f32 %v446_v16, %v1200_v58  ;;  %v674_v32 = vand.u32 2147483647, %v1370_v55  ;;  %v675_v34 = vand.u32 2147483647, %v1372_v57 }
  0x4c   : > { %v1057_v29 = vpop.eup %1056  ;;  %v452_v14 = vmul.f32 0.6931472, %v1055_v27  ;;  %v462_v44 = vadd.f32 %v448_v23, %v1202_v59  ;;  %v676_v43 = vand.u32 2147483647, %v1374_v12  ;;  %v677_v4 = vand.u32 2147483647, %v1376_v61 }
  0x4d   : > { %v1059_v48 = vpop.eup %1058  ;;  %v454_v17 = vmul.f32 0.6931472, %v1057_v29  ;;  %v463_v39 = vadd.f32 %v450_v13, %v1204_v60  ;;  %v567_v41 = vsub.f32 %v461_v25, %v1320_v20  ;;  %v678_v58 = vand.u32 2147483647, %v1383_v7 }
  0x4e   : > { %v1061_v42 = vpop.eup %1060  ;;  %v456_v46 = vmul.f32 0.6931472, %v1059_v48  ;;  %v464_v6 = vadd.f32 %v452_v14, %v1206_v62  ;;  %v568_v22 = vsub.f32 %v462_v44, %v1323_v31  ;;  %v679_v59 = vand.u32 2147483647, %v1385_v8 }
  0x4f   : > { %v1063_v49 = vpop.eup %1062  ;;  %v458_v3 = vmul.f32 0.6931472, %v1061_v42  ;;  %v465_v50 = vadd.f32 %v454_v17, %v1208_v63  ;;  %v569_v11 = vsub.f32 %v463_v39, %v1327_v28  ;;  %v680_v60 = vand.u32 2147483647, %v1387_v26 }
  0x50   : > { %v460_v52 = vmul.f32 0.6931472, %v1063_v49  ;;  %v466_v20 = vadd.f32 %v456_v46, %v1210_v0  ;;  %v570_v53 = vsub.f32 %v464_v6, %v1330_v36  ;;  %v583_v54 = vcombine.low %v567_v41, %v568_v22 }
  0x51   : > { %v467_v62 = vadd.f32 %v458_v3, %v1226_v30  ;;  %v571_v31 = vsub.f32 %v465_v50, %v1333_v15  ;;  %v1413_v2 = vrot.slane %v1282_v37, %v501_v33  ;;  %v681_v63 = vand.u32 2147483647, %v1389_v9 }
  0x52   : > { %v468_v28 = vadd.f32 %v460_v52, %v1228_v35  ;;  %v572_v16 = vsub.f32 %v466_v20, %v1341_v38  ;;  %v584_v21 = vcombine.low %v569_v11, %v570_v53  ;;  %v593_v0 = vrot.slane %v583_v54, %v1287_v40 }
  0x53   : > { %vm1421_vm9 = vcmp.lt.f32.partialorder %v674_v32, 1.0  ;;  %vm1427_vm10 = vcmp.lt.f32.partialorder %v675_v34, 1.0  ;;  %vm1433_vm11 = vcmp.lt.f32.partialorder %v676_v43, 1.0  ;;  %v573_v35 = vsub.f32 %v467_v62, %v1358_v56 }
  0x54   : > { %vm1440_vm12 = vcmp.lt.f32.partialorder %v677_v4, 1.0  ;;  %vm1444_vm13 = vcmp.lt.f32.partialorder %v678_v58, 1.0  ;;  %vm1448_vm14 = vcmp.lt.f32.partialorder %v679_v59, 1.0  ;;  %v574_v38 = vsub.f32 %v468_v28, %v566_v18 }
  0x55   : > { %v585_v23 = vcombine.low %v571_v31, %v572_v16  ;;  %v600_v27 = vrot.slane %v584_v21, %v1287_v40  ;;  %vm1453_vm15 = vcmp.lt.f32.partialorder %v680_v60, 1.0  ;;  %vm1457_vm0 = vcmp.lt.f32.partialorder %v681_v63, 1.0 }
  0x56   : > { %v690_v25 = vmul.f32 0.5, %v1370_v55  ;;  %v691_v29 = vmul.f32 0.5, %v1372_v57  ;;  %v692_v14 = vmul.f32 0.5, %v1374_v12  ;;  %vm771_vm1 = vcmask 1043456  }
  0x57   : > { %v586_v44 = vcombine.low %v573_v35, %v574_v38  ;;  %v607_v18 = vrot.slane %v585_v23, %v1287_v40  ;;  %v615_v48 = vcombine.low %v593_v0, %v600_v27  ;;  %v693_v17 = vmul.f32 0.5, %v1376_v61 }
  0x58   : > { %v694_v39 = vmul.f32 0.5, %v1383_v7  ;;  %v695_v41 = vmul.f32 0.5, %v1385_v8  ;;  %v696_v42 = vmul.f32 0.5, %v1387_v26  ;;  %v697_v46 = vmul.f32 0.5, %v1389_v9 }
  0x59   : > { %v614_v6 = vrot.slane %v586_v44, %v1287_v40  ;;  %v623_v22 = vrot.slane %v615_v48, %v1287_v40  ;;  %v698_v49 = vmul.f32 %v690_v25, %v1370_v55  ;;  %v699_v3 = vmul.f32 %v691_v29, %v1372_v57 }
  0x5a   : > { %v700_v50 = vmul.f32 %v692_v14, %v1374_v12  ;;  %v701_v11 = vmul.f32 %v693_v17, %v1376_v61  ;;  %v702_v52 = vmul.f32 %v694_v39, %v1383_v7  ;;  %v703_v20 = vmul.f32 %v695_v41, %v1385_v8 }
  0x5b   : > { %v616_v53 = vcombine.low %v607_v18, %v614_v6  ;;  %v704_v54 = vmul.f32 %v696_v42, %v1387_v26  ;;  %v705_v62 = vmul.f32 %v697_v46, %v1389_v9  ;;  %v994_v31 = vadd.f32 -0.5, %v674_v32 }
  0x5c   : > { %v995_v28 = vadd.f32 -0.5, %v675_v34  ;;  %v996_v16 = vadd.f32 -0.5, %v676_v43  ;;  %v997_v21 = vadd.f32 -0.5, %v677_v4  ;;  %v998_v7 = vadd.f32 -0.5, %v678_v58 }
  0x5d   : > { %v630_v8 = vrot.slane %v616_v53, %v1287_v40  ;;  %v999_v0 = vadd.f32 -0.5, %v679_v59  ;;  %v1000_v35 = vadd.f32 -0.5, %v680_v60  ;;  %v1001_v26 = vadd.f32 -0.5, %v681_v63 }
  0x5e   : > { %v714_v55 = vsel %vm1421_vm9, %v698_v49, %v994_v31  ;;  %v715_v57 = vsel %vm1427_vm10, %v699_v3, %v995_v28  ;;  %v716_v12 = vsel %vm1433_vm11, %v700_v50, %v996_v16  ;;  %v717_v40 = vsel %vm1440_vm12, %v701_v11, %v997_v21 }
  0x5f   : > { %v631_v61 = vcombine.low %v623_v22, %v630_v8  ;;  %v718_v9 = vsel %vm1444_vm13, %v702_v52, %v998_v7  ;;  %v719_v32 = vsel %vm1448_vm14, %v703_v20, %v999_v0  ;;  %v720_v34 = vsel %vm1453_vm15, %v704_v54, %v1000_v35 }
  0x60   : > { %v721_v43 = vsel %vm1457_vm0, %v705_v62, %v1001_v26  ;;  %v763_v4 = vmul.f32 %v1339_v19, %v714_v55  ;;  %v764_v58 = vmul.f32 %v1346_v51, %v715_v57  ;;  %v765_v59 = vmul.f32 %v1351_v45, %v716_v12 }
  0x61   : > { %633 = vst [vmem:[%s308_s9] sm:$0xff] %v631_v61  ;;  %v766_v60 = vmul.f32 %v1356_v5, %v717_v40  ;;  %v767_v63 = vmul.f32 %v1363_v47, %v718_v9  ;;  %v768_v30 = vmul.f32 %v1368_v10, %v719_v32  ;;  %v769_v1 = vmul.f32 %v1381_v24, %v720_v34 }
  0x62   : > { %v770_v33 = vmul.f32 %v1413_v2, %v721_v43  ;;  %v772_v37 = vsel %vm771_vm1, %v763_v4, 0.0  ;;  %v779_v36 = vsel %vm771_vm1, %v764_v58, 0.0  ;;  %v786_v19 = vsel %vm771_vm1, %v765_v59, 0.0 }
  0x63   : > { %v773_v51 = vrot.slane %v772_v37, 4  ;;  %v780_v15 = vrot.slane %v779_v36, 4  ;;  %v787_v45 = vrot.slane %v786_v19, 4  ;;  %v793_v38 = vsel %vm771_vm1, %v766_v60, 0.0 }
  0x64   : > { %v794_v5 = vrot.slane %v793_v38, 4  ;;  %v800_v47 = vsel %vm771_vm1, %v767_v63, 0.0  ;;  %v807_v10 = vsel %vm771_vm1, %v768_v30, 0.0  ;;  %v814_v24 = vsel %vm771_vm1, %v769_v1, 0.0  ;;  %v840_v1 = vld [vmem:[%s1143_s21] sm:$0x1] }
  0x65   : > { %v774_v23 = vadd.f32 %v773_v51, %v772_v37  ;;  %v781_v2 = vadd.f32 %v780_v15, %v779_v36  ;;  %v788_v27 = vadd.f32 %v787_v45, %v786_v19  ;;  %v801_v56 = vrot.slane %v800_v47, 4 }
  0x66   : > { %v795_v13 = vadd.f32 %v794_v5, %v793_v38  ;;  %v808_v25 = vrot.slane %v807_v10, 4  ;;  %v815_v29 = vrot.slane %v814_v24, 4  ;;  %v821_v14 = vsel %vm771_vm1, %v770_v33, 0.0 }
  0x67   : > { %v775_v44 = vrot.slane %v774_v23, 2  ;;  %v782_v18 = vrot.slane %v781_v2, 2  ;;  %v789_v48 = vrot.slane %v788_v27, 2  ;;  %v802_v17 = vadd.f32 %v801_v56, %v800_v47 }
  0x68   : > { %v796_v39 = vrot.slane %v795_v13, 2  ;;  %v809_v41 = vadd.f32 %v808_v25, %v807_v10  ;;  %v816_v42 = vadd.f32 %v815_v29, %v814_v24  ;;  %v822_v46 = vrot.slane %v821_v14, 4 }
  0x69   : > { %v776_v6 = vadd.f32 %v775_v44, %v774_v23  ;;  %v783_v22 = vadd.f32 %v782_v18, %v781_v2  ;;  %v790_v49 = vadd.f32 %v789_v48, %v788_v27  ;;  %v803_v3 = vrot.slane %v802_v17, 2 }
  0x6a   : > { %v797_v50 = vadd.f32 %v796_v39, %v795_v13  ;;  %v810_v11 = vrot.slane %v809_v41, 2  ;;  %v817_v52 = vrot.slane %v816_v42, 2  ;;  %v823_v20 = vadd.f32 %v822_v46, %v821_v14 }
  0x6b   : > { %v777_v53 = vrot.slane %v776_v6, 1  ;;  %v784_v54 = vrot.slane %v783_v22, 1  ;;  %v791_v62 = vrot.slane %v790_v49, 1  ;;  %v804_v31 = vadd.f32 %v803_v3, %v802_v17 }
  0x6c   : > { %v798_v28 = vrot.slane %v797_v50, 1  ;;  %v811_v16 = vadd.f32 %v810_v11, %v809_v41  ;;  %v818_v21 = vadd.f32 %v817_v52, %v816_v42  ;;  %v824_v7 = vrot.slane %v823_v20, 2 }
  0x6d   : > { %v778_v8 = vadd.f32 %v777_v53, %v776_v6  ;;  %v785_v0 = vadd.f32 %v784_v54, %v783_v22  ;;  %v792_v35 = vadd.f32 %v791_v62, %v790_v49  ;;  %v805_v26 = vrot.slane %v804_v31, 1 }
  0x6e   : > { %v799_v55 = vadd.f32 %v798_v28, %v797_v50  ;;  %v812_v57 = vrot.slane %v811_v16, 1  ;;  %v825_v12 = vadd.f32 %v824_v7, %v823_v20  ;;  %v819_v9 = vrot.slane %v818_v21, 1 }
  0x6f   : > { %v828_v40 = vadd.f32 %v785_v0, %v778_v8  ;;  %v806_v61 = vadd.f32 %v805_v26, %v804_v31 }
  0x70   : > { %v813_v34 = vadd.f32 %v812_v57, %v811_v16  ;;  %v826_v43 = vrot.slane %v825_v12, 1  ;;  %v820_v58 = vadd.f32 %v819_v9, %v818_v21 }
  0x71   : > { %v829_v32 = vadd.f32 %v828_v40, %v792_v35 }
  0x72   : > { %v827_v60 = vadd.f32 %v826_v43, %v825_v12 }
  0x73   : > { %v830_v4 = vadd.f32 %v829_v32, %v799_v55 }
  0x75   : > { %v831_v59 = vadd.f32 %v830_v4, %v806_v61 }
  0x77   : > { %v832_v63 = vadd.f32 %v831_v59, %v813_v34 }
  0x79   : > { %v833_v30 = vadd.f32 %v832_v63, %v820_v58 }
  0x7b   : > { %v834_v33 = vadd.f32 %v833_v30, %v827_v60 }
  0x7d   : > { %v841_v37 = vadd.f32 %v840_v1, %v834_v33 }
  0x7f   : > { %842 = vst [vmem:[%s1143_s21] sm:$0x1] %v841_v37 }
  0x80 PF: > { %s15_s17 = sadd.s32 1, %s1086_s17   ;;  %s1558_s15 = smov %s1082_s16 }
  0x81   : > { %p12_p5 = scmp.ge.s32.totalorder %s15_s17, 4   ;;  %s1559_s16 = smov %s1561_s18 }
  0x83   :  { %14 = sbr.rel (!%p12_p5) target bundleno = 2 (0x2), region = 84 }

</bundles_post_ra>
